<compile_context>
chip_gen: v7x
topology: tpu7x:2x2x1
jax: 0.10.0
libtpu: 0.0.40
codegen_flags: <defaults>
</compile_context>

<pallas_src>
import jax
import jax.numpy as jnp
import numpy as np
from jax.experimental import pallas as pl
from jax.experimental.pallas import tpu as pltpu

EPS = 1e-5
K = 3  # kernel_size (3x3, padding=1 / 'same')


def _make_kernel(N, C, H, W, PAD):
    NC = N * C
    HW = H * W
    inv_m = 1.0 / float(N * H * W)
    # tap order t = kh*K + kw, offsets (dh, dw) = (kh-1, kw-1); must match the column
    # layout of the block-diagonal weight matrices built in the wrapper.
    offsets = [(kh - 1, kw - 1) for kh in range(K) for kw in range(K)]
    assert PAD >= W + 1  # halo must absorb every h-border shifted read (|shift| <= W+1)

    def kernel(x_ref, w1_ref, g1_ref, b1_ref, w2_ref, g2_ref, b2_ref, gmat_ref,
               out_ref, pad_ref, im_ref):
        # x_ref:    (NC, HW)        input; (n, c) on sublanes, flat (h, w) on lanes
        # w*_ref:   (NC, K*K*NC)    batch-block-diagonal im2col weights
        # g*/b*:    (NC, 1)         BN affine params, tiled over the batch rows
        # gmat_ref: (NC, NC)        1.0 where two rows share a channel, else 0.0
        # out_ref:  (NC, HW)        lane-dense output slab
        # pad_ref:  (NC, PAD+HW+PAD) halo-padded scratch shared by both convs
        # im_ref:   (K*K*NC, HW)    im2col slab (MXU RHS), rebuilt per conv

        x = x_ref[...]  # (NC, HW) f32; reused directly for the residual add

        # ---- w-border masks, computed in-kernel from an iota (no index array DMA).
        lane = jax.lax.broadcasted_iota(jnp.int32, (1, HW), 1)
        if (W & (W - 1)) == 0:
            w_pos = lane & (W - 1)
        else:
            w_pos = lane % W
        wmask = {-1: jnp.where(w_pos >= 1, 1.0, 0.0),        # (h, w-1) in bounds
                 +1: jnp.where(w_pos <= W - 2, 1.0, 0.0)}     # (h, w+1) in bounds

        # ---- zero only the halo bands once; both convs reuse them.
        pad_ref[:, :PAD] = jnp.zeros((NC, PAD), jnp.float32)
        pad_ref[:, PAD + HW:] = jnp.zeros((NC, PAD), jnp.float32)
        pad_ref[:, PAD:PAD + HW] = x

        def conv3x3(w_ref):
            """3x3 'same' conv of the tensor currently in pad_ref, on the MXU.

            Nine shifted-window reads build the im2col slab; w-border wraps are killed
            by the f32 masks (multiply rides along with the copy), h-border (and
            cross-image) reads land in the zero halo because PAD >= W + 1 and each
            sublane row holds exactly one (image, channel).  One dot per conv."""
            for t, (dh, dw) in enumerate(offsets):
                base = PAD + dh * W + dw
                win = pad_ref[:, base:base + HW]              # (NC, HW) shifted window
                if dw != 0:
                    win = win * wmask[dw]
                im_ref[t * NC:(t + 1) * NC, :] = win
            return jnp.dot(w_ref[...], im_ref[...],
                           preferred_element_type=jnp.float32)   # (NC, HW) f32

        def batchnorm(acc, g_ref, b_ref):
            """Training-mode BN, two-pass (mean, then centered variance).

            gmat @ t sums t over the batch rows of each channel and broadcasts the
            result back over the batch (MXU), so per-channel stats need no sublane
            gymnastics on the VPU/XLU."""
            gsum = jnp.dot(gmat_ref[...], acc, preferred_element_type=jnp.float32)
            mean = jnp.sum(gsum, axis=1, keepdims=True) * inv_m          # (NC, 1)
            centered = acc - mean
            gss = jnp.dot(gmat_ref[...], centered * centered,
                          preferred_element_type=jnp.float32)
            var = jnp.sum(gss, axis=1, keepdims=True) * inv_m            # (NC, 1)
            scale = g_ref[...] * jax.lax.rsqrt(var + EPS)
            return centered * scale + b_ref[...]

        # ---- conv1 -> bn1 -> relu
        a1 = jnp.maximum(batchnorm(conv3x3(w1_ref), g1_ref, b1_ref), 0.0)

        # ---- reuse the padded scratch (halos still zero) as conv2's input
        pad_ref[:, PAD:PAD + HW] = a1

        # ---- conv2 -> bn2 -> residual add -> relu (projection=False: Cin==Cout, stride 1)
        y2 = batchnorm(conv3x3(w2_ref), g2_ref, b2_ref)
        out_ref[...] = jnp.maximum(x + y2, 0.0)

    return kernel


@jax.jit
def conv2block_forward(x_nchw, w1, g1, b1, w2, g2, b2):
    """x_nchw: (N, C, H, W) -> (N, C, H, W); matches conv2Block(projection=False).forward."""
    N, C, H, W = x_nchw.shape
    KH, KW, Cin, Cout = w1.shape
    # projection=False branch only: the residual add requires Cin == Cout and stride 1.
    assert KH == K and KW == K and Cin == C and Cout == C, (
        "projection=False basic block requires 3x3 convs with Cin == Cout == C")
    NC, HW = N * C, H * W
    assert HW % 128 == 0, "H*W must be a multiple of 128 for the lane-dense layout"

    f32 = jnp.float32
    # NCHW consumed directly: (N, C, H, W) -> (N*C, H*W) is a pure reshape (no transpose).
    x_flat = x_nchw.reshape(NC, HW).astype(f32)

    # Halo for the flattened 3x3 'same' conv is W+1 lanes; round up to a multiple of 128
    # so the scratch interior stays lane-aligned.
    PAD = ((W + 1 + 127) // 128) * 128

    def block_diag(w):
        # w: (K, K, Cin, Cout) HWIO  ->  (NC, K*K*NC) with
        # Wblk[n*C+co, t*NC + n'*C + ci] = w[kh, kw, ci, co] * (n == n'),  t = kh*K + kw.
        w_t = jnp.transpose(w.astype(f32), (0, 1, 3, 2)).reshape(K * K, C, C)  # [t, co, ci]
        eye = jnp.eye(N, dtype=f32)
        return jnp.einsum('nm,tij->nitmj', eye, w_t).reshape(NC, K * K * NC)

    def tile_param(p):
        # (C,) -> (NC, 1): per-channel value replicated for every batch row.
        return jnp.tile(p.astype(f32).reshape(1, C), (N, 1)).reshape(NC, 1)

    # Channel-group matrix: 1.0 where two (n, c) rows share the same channel c.
    ch = jnp.arange(NC, dtype=jnp.int32) % C
    gmat = (ch[:, None] == ch[None, :]).astype(f32)

    vmem = pl.BlockSpec(memory_space=pltpu.MemorySpace.VMEM)
    out_flat = pl.pallas_call(
        _make_kernel(N, C, H, W, PAD),
        out_shape=jax.ShapeDtypeStruct((NC, HW), f32),
        in_specs=[vmem] * 8,
        out_specs=vmem,
        scratch_shapes=[pltpu.VMEM((NC, HW + 2 * PAD), f32),      # halo-padded activation
                        pltpu.VMEM((K * K * NC, HW), f32)],       # im2col slab (MXU RHS)
    )(x_flat, block_diag(w1), tile_param(g1), tile_param(b1),
      block_diag(w2), tile_param(g2), tile_param(b2), gmat)

    # Pure reshape back to NCHW (no transpose).
    return out_flat.reshape(N, C, H, W).astype(x_nchw.dtype)


def _reference_forward(x_nchw, w1, g1, b1, w2, g2, b2):
    """Pure-JAX reference (same math) for validation; convs at HIGHEST precision."""
    def conv(x, w):  # x: NHWC, w: HWIO
        return jax.lax.conv_general_dilated(
            x, w, window_strides=(1, 1), padding=((1, 1), (1, 1)),
            dimension_numbers=("NHWC", "HWIO", "NHWC"),
            precision=jax.lax.Precision.HIGHEST)

    def bn(y, g, b):
        mean = jnp.mean(y, axis=(0, 1, 2), keepdims=True)
        var = jnp.mean((y - mean) ** 2, axis=(0, 1, 2), keepdims=True)
        return (y - mean) * jax.lax.rsqrt(var + EPS) * g + b

    x = jnp.transpose(x_nchw, (0, 2, 3, 1)).astype(jnp.float32)
    a1 = jax.nn.relu(bn(conv(x, w1), g1, b1))
    out = jax.nn.relu(x + bn(conv(a1, w2), g2, b2))
    return jnp.transpose(out, (0, 3, 1, 2))


if __name__ == "__main__":
    # Small shapes consistent with the module: in_channels == out_channels == 4,
    # stride=1, projection=False (the residual add requires matching shapes).
    N, C, H, W = 2, 4, 16, 16

    key = jax.random.PRNGKey(0)
    k_x, k_w1, k_w2, k_g1, k_b1, k_g2, k_b2 = jax.random.split(key, 7)

    x = jax.random.normal(k_x, (N, C, H, W), jnp.float32)

    # Conv weights in HWIO layout: (KH, KW, Cin, Cout); no bias (bias=False).
    fan_in = C * K * K
    w1 = jax.random.normal(k_w1, (K, K, C, C), jnp.float32) / np.sqrt(fan_in)
    w2 = jax.random.normal(k_w2, (K, K, C, C), jnp.float32) / np.sqrt(fan_in)

    # BatchNorm affine params (deterministic, nontrivial).
    g1 = 1.0 + 0.1 * jax.random.normal(k_g1, (C,), jnp.float32)
    b1 = 0.1 * jax.random.normal(k_b1, (C,), jnp.float32)
    g2 = 1.0 + 0.1 * jax.random.normal(k_g2, (C,), jnp.float32)
    b2 = 0.1 * jax.random.normal(k_b2, (C,), jnp.float32)

    out = conv2block_forward(x, w1, g1, b1, w2, g2, b2)
    jax.block_until_ready(out)

    ref = _reference_forward(x, w1, g1, b1, w2, g2, b2)
    # Tolerance covers the MXU's default f32 contraction precision (which may use bf16
    # multiplication passes on TPU); a real indexing/masking/layout bug would show up
    # as O(1) errors, orders of magnitude above this.
    np.testing.assert_allclose(np.asarray(out), np.asarray(ref), rtol=2e-2, atol=2e-2)

    print("KERNEL_OK")
</pallas_src>

<mosaic_0001>
module attributes {stable_mosaic.version = 11 : i64} {
  func.func @kernel(%arg0: memref<8x256xf32, #tpu.memory_space<vmem>>, %arg1: memref<8x72xf32, #tpu.memory_space<vmem>>, %arg2: memref<8x1xf32, #tpu.memory_space<vmem>>, %arg3: memref<8x1xf32, #tpu.memory_space<vmem>>, %arg4: memref<8x72xf32, #tpu.memory_space<vmem>>, %arg5: memref<8x1xf32, #tpu.memory_space<vmem>>, %arg6: memref<8x1xf32, #tpu.memory_space<vmem>>, %arg7: memref<8x8xf32, #tpu.memory_space<vmem>>, %arg8: memref<8x256xf32, #tpu.memory_space<vmem>>, %arg9: memref<8x512xf32, #tpu.memory_space<vmem>>, %arg10: memref<72x256xf32, #tpu.memory_space<vmem>>) attributes {dimension_semantics = [], scalar_prefetch = 0 : i64, scratch_operands = 2 : i64, tpu.core_type = #tpu.core_type<tc>} {
    %c0 = arith.constant 0 : index
    %c0_0 = arith.constant 0 : index
    %0 = vector.load %arg0[%c0, %c0_0] : memref<8x256xf32, #tpu.memory_space<vmem>>, vector<8x256xf32>
    %1 = tpu.iota {dimensions = array<i32: 1>} : vector<1x256xi32>
    %c15_i32 = arith.constant 15 : i32
    %2 = vector.broadcast %c15_i32 : i32 to vector<1x256xi32>
    %3 = arith.andi %1, %2 : vector<1x256xi32>
    %c1_i32 = arith.constant 1 : i32
    %4 = vector.broadcast %c1_i32 : i32 to vector<1x256xi32>
    %5 = arith.cmpi sge, %3, %4 : vector<1x256xi32>
    %cst = arith.constant 1.000000e+00 : f32
    %cst_1 = arith.constant 0.000000e+00 : f32
    %6 = vector.broadcast %cst : f32 to vector<1x256xf32>
    %7 = vector.broadcast %cst_1 : f32 to vector<1x256xf32>
    %8 = arith.select %5, %6, %7 : vector<1x256xi1>, vector<1x256xf32>
    %c14_i32 = arith.constant 14 : i32
    %9 = vector.broadcast %c14_i32 : i32 to vector<1x256xi32>
    %10 = arith.cmpi sle, %3, %9 : vector<1x256xi32>
    %cst_2 = arith.constant 1.000000e+00 : f32
    %cst_3 = arith.constant 0.000000e+00 : f32
    %11 = vector.broadcast %cst_2 : f32 to vector<1x256xf32>
    %12 = vector.broadcast %cst_3 : f32 to vector<1x256xf32>
    %13 = arith.select %10, %11, %12 : vector<1x256xi1>, vector<1x256xf32>
    %cst_4 = arith.constant 0.000000e+00 : f32
    %14 = vector.broadcast %cst_4 : f32 to vector<8x128xf32>
    %c0_5 = arith.constant 0 : index
    %c0_6 = arith.constant 0 : index
    %15 = vector.load %arg9[%c0_5, %c0_6] : memref<8x512xf32, #tpu.memory_space<vmem>>, vector<8x128xf32>
    tpu.vector_store %arg9[%c0_5, %c0_6], %14 {strides = array<i32>} : memref<8x512xf32, #tpu.memory_space<vmem>>, vector<8x128xf32>,
    %cst_7 = arith.constant 0.000000e+00 : f32
    %16 = vector.broadcast %cst_7 : f32 to vector<8x128xf32>
    %c0_8 = arith.constant 0 : index
    %c384 = arith.constant 384 : index
    %17 = vector.load %arg9[%c0_8, %c384] : memref<8x512xf32, #tpu.memory_space<vmem>>, vector<8x128xf32>
    tpu.vector_store %arg9[%c0_8, %c384], %16 {strides = array<i32>} : memref<8x512xf32, #tpu.memory_space<vmem>>, vector<8x128xf32>,
    %c0_9 = arith.constant 0 : index
    %c128 = arith.constant 128 : index
    %18 = vector.load %arg9[%c0_9, %c128] : memref<8x512xf32, #tpu.memory_space<vmem>>, vector<8x256xf32>
    tpu.vector_store %arg9[%c0_9, %c128], %0 {strides = array<i32>} : memref<8x512xf32, #tpu.memory_space<vmem>>, vector<8x256xf32>,
    %c0_10 = arith.constant 0 : index
    %c111 = arith.constant 111 : index
    %19 = vector.load %arg9[%c0_10, %c111] : memref<8x512xf32, #tpu.memory_space<vmem>>, vector<8x256xf32>
    %20 = vector.broadcast %8 : vector<1x256xf32> to vector<8x256xf32>
    %21 = arith.mulf %19, %20 : vector<8x256xf32>
    %c0_11 = arith.constant 0 : index
    %c0_12 = arith.constant 0 : index
    %22 = vector.load %arg10[%c0_11, %c0_12] : memref<72x256xf32, #tpu.memory_space<vmem>>, vector<8x256xf32>
    tpu.vector_store %arg10[%c0_11, %c0_12], %21 {strides = array<i32>} : memref<72x256xf32, #tpu.memory_space<vmem>>, vector<8x256xf32>,
    %c0_13 = arith.constant 0 : index
    %c112 = arith.constant 112 : index
    %23 = vector.load %arg9[%c0_13, %c112] : memref<8x512xf32, #tpu.memory_space<vmem>>, vector<8x256xf32>
    %c8 = arith.constant 8 : index
    %c0_14 = arith.constant 0 : index
    %24 = vector.load %arg10[%c8, %c0_14] : memref<72x256xf32, #tpu.memory_space<vmem>>, vector<8x256xf32>
    tpu.vector_store %arg10[%c8, %c0_14], %23 {strides = array<i32>} : memref<72x256xf32, #tpu.memory_space<vmem>>, vector<8x256xf32>,
    %c0_15 = arith.constant 0 : index
    %c113 = arith.constant 113 : index
    %25 = vector.load %arg9[%c0_15, %c113] : memref<8x512xf32, #tpu.memory_space<vmem>>, vector<8x256xf32>
    %26 = vector.broadcast %13 : vector<1x256xf32> to vector<8x256xf32>
    %27 = arith.mulf %25, %26 : vector<8x256xf32>
    %c16 = arith.constant 16 : index
    %c0_16 = arith.constant 0 : index
    %28 = vector.load %arg10[%c16, %c0_16] : memref<72x256xf32, #tpu.memory_space<vmem>>, vector<8x256xf32>
    tpu.vector_store %arg10[%c16, %c0_16], %27 {strides = array<i32>} : memref<72x256xf32, #tpu.memory_space<vmem>>, vector<8x256xf32>,
    %c0_17 = arith.constant 0 : index
    %c127 = arith.constant 127 : index
    %29 = vector.load %arg9[%c0_17, %c127] : memref<8x512xf32, #tpu.memory_space<vmem>>, vector<8x256xf32>
    %30 = vector.broadcast %8 : vector<1x256xf32> to vector<8x256xf32>
    %31 = arith.mulf %29, %30 : vector<8x256xf32>
    %c24 = arith.constant 24 : index
    %c0_18 = arith.constant 0 : index
    %32 = vector.load %arg10[%c24, %c0_18] : memref<72x256xf32, #tpu.memory_space<vmem>>, vector<8x256xf32>
    tpu.vector_store %arg10[%c24, %c0_18], %31 {strides = array<i32>} : memref<72x256xf32, #tpu.memory_space<vmem>>, vector<8x256xf32>,
    %c0_19 = arith.constant 0 : index
    %c128_20 = arith.constant 128 : index
    %33 = vector.load %arg9[%c0_19, %c128_20] : memref<8x512xf32, #tpu.memory_space<vmem>>, vector<8x256xf32>
    %c32 = arith.constant 32 : index
    %c0_21 = arith.constant 0 : index
    %34 = vector.load %arg10[%c32, %c0_21] : memref<72x256xf32, #tpu.memory_space<vmem>>, vector<8x256xf32>
    tpu.vector_store %arg10[%c32, %c0_21], %33 {strides = array<i32>} : memref<72x256xf32, #tpu.memory_space<vmem>>, vector<8x256xf32>,
    %c0_22 = arith.constant 0 : index
    %c129 = arith.constant 129 : index
    %35 = vector.load %arg9[%c0_22, %c129] : memref<8x512xf32, #tpu.memory_space<vmem>>, vector<8x256xf32>
    %36 = vector.broadcast %13 : vector<1x256xf32> to vector<8x256xf32>
    %37 = arith.mulf %35, %36 : vector<8x256xf32>
    %c40 = arith.constant 40 : index
    %c0_23 = arith.constant 0 : index
    %38 = vector.load %arg10[%c40, %c0_23] : memref<72x256xf32, #tpu.memory_space<vmem>>, vector<8x256xf32>
    tpu.vector_store %arg10[%c40, %c0_23], %37 {strides = array<i32>} : memref<72x256xf32, #tpu.memory_space<vmem>>, vector<8x256xf32>,
    %c0_24 = arith.constant 0 : index
    %c143 = arith.constant 143 : index
    %39 = vector.load %arg9[%c0_24, %c143] : memref<8x512xf32, #tpu.memory_space<vmem>>, vector<8x256xf32>
    %40 = vector.broadcast %8 : vector<1x256xf32> to vector<8x256xf32>
    %41 = arith.mulf %39, %40 : vector<8x256xf32>
    %c48 = arith.constant 48 : index
    %c0_25 = arith.constant 0 : index
    %42 = vector.load %arg10[%c48, %c0_25] : memref<72x256xf32, #tpu.memory_space<vmem>>, vector<8x256xf32>
    tpu.vector_store %arg10[%c48, %c0_25], %41 {strides = array<i32>} : memref<72x256xf32, #tpu.memory_space<vmem>>, vector<8x256xf32>,
    %c0_26 = arith.constant 0 : index
    %c144 = arith.constant 144 : index
    %43 = vector.load %arg9[%c0_26, %c144] : memref<8x512xf32, #tpu.memory_space<vmem>>, vector<8x256xf32>
    %c56 = arith.constant 56 : index
    %c0_27 = arith.constant 0 : index
    %44 = vector.load %arg10[%c56, %c0_27] : memref<72x256xf32, #tpu.memory_space<vmem>>, vector<8x256xf32>
    tpu.vector_store %arg10[%c56, %c0_27], %43 {strides = array<i32>} : memref<72x256xf32, #tpu.memory_space<vmem>>, vector<8x256xf32>,
    %c0_28 = arith.constant 0 : index
    %c145 = arith.constant 145 : index
    %45 = vector.load %arg9[%c0_28, %c145] : memref<8x512xf32, #tpu.memory_space<vmem>>, vector<8x256xf32>
    %46 = vector.broadcast %13 : vector<1x256xf32> to vector<8x256xf32>
    %47 = arith.mulf %45, %46 : vector<8x256xf32>
    %c64 = arith.constant 64 : index
    %c0_29 = arith.constant 0 : index
    %48 = vector.load %arg10[%c64, %c0_29] : memref<72x256xf32, #tpu.memory_space<vmem>>, vector<8x256xf32>
    tpu.vector_store %arg10[%c64, %c0_29], %47 {strides = array<i32>} : memref<72x256xf32, #tpu.memory_space<vmem>>, vector<8x256xf32>,
    %c0_30 = arith.constant 0 : index
    %c0_31 = arith.constant 0 : index
    %49 = vector.load %arg1[%c0_30, %c0_31] : memref<8x72xf32, #tpu.memory_space<vmem>>, vector<8x72xf32>
    %c0_32 = arith.constant 0 : index
    %c0_33 = arith.constant 0 : index
    %50 = vector.load %arg10[%c0_32, %c0_33] : memref<72x256xf32, #tpu.memory_space<vmem>>, vector<72x256xf32>
    %cst_34 = arith.constant dense<0.000000e+00> : vector<8x256xf32>
    %51 = tpu.matmul %49, %50, %cst_34 {dimension_numbers = #tpu.dot_dimension_numbers<[1], [0], [0], [1], [0, 0, 1, 1], [], []>} : vector<8x72xf32>, vector<72x256xf32>, vector<8x256xf32> -> vector<8x256xf32>
    %c0_35 = arith.constant 0 : index
    %c0_36 = arith.constant 0 : index
    %52 = vector.load %arg7[%c0_35, %c0_36] : memref<8x8xf32, #tpu.memory_space<vmem>>, vector<8x8xf32>
    %cst_37 = arith.constant dense<0.000000e+00> : vector<8x256xf32>
    %53 = tpu.matmul %52, %51, %cst_37 {dimension_numbers = #tpu.dot_dimension_numbers<[1], [0], [0], [1], [0, 0, 1, 1], [], []>} : vector<8x8xf32>, vector<8x256xf32>, vector<8x256xf32> -> vector<8x256xf32>
    %cst_38 = arith.constant dense<0.000000e+00> : vector<8xf32>
    %54 = vector.multi_reduction <add>, %53, %cst_38 [1] : vector<8x256xf32> to vector<8xf32>
    %55 = vector.shape_cast %54 : vector<8xf32> to vector<8x1xf32>
    %cst_39 = arith.constant 0.001953125 : f32
    %56 = vector.broadcast %cst_39 : f32 to vector<8x1xf32>
    %57 = arith.mulf %55, %56 : vector<8x1xf32>
    %58 = vector.broadcast %57 : vector<8x1xf32> to vector<8x256xf32>
    %59 = arith.subf %51, %58 : vector<8x256xf32>
    %c0_40 = arith.constant 0 : index
    %c0_41 = arith.constant 0 : index
    %60 = vector.load %arg7[%c0_40, %c0_41] : memref<8x8xf32, #tpu.memory_space<vmem>>, vector<8x8xf32>
    %61 = arith.mulf %59, %59 : vector<8x256xf32>
    %cst_42 = arith.constant dense<0.000000e+00> : vector<8x256xf32>
    %62 = tpu.matmul %60, %61, %cst_42 {dimension_numbers = #tpu.dot_dimension_numbers<[1], [0], [0], [1], [0, 0, 1, 1], [], []>} : vector<8x8xf32>, vector<8x256xf32>, vector<8x256xf32> -> vector<8x256xf32>
    %cst_43 = arith.constant dense<0.000000e+00> : vector<8xf32>
    %63 = vector.multi_reduction <add>, %62, %cst_43 [1] : vector<8x256xf32> to vector<8xf32>
    %64 = vector.shape_cast %63 : vector<8xf32> to vector<8x1xf32>
    %cst_44 = arith.constant 0.001953125 : f32
    %65 = vector.broadcast %cst_44 : f32 to vector<8x1xf32>
    %66 = arith.mulf %64, %65 : vector<8x1xf32>
    %c0_45 = arith.constant 0 : index
    %c0_46 = arith.constant 0 : index
    %67 = vector.load %arg2[%c0_45, %c0_46] : memref<8x1xf32, #tpu.memory_space<vmem>>, vector<8x1xf32>
    %cst_47 = arith.constant 9.99999974E-6 : f32
    %68 = vector.broadcast %cst_47 : f32 to vector<8x1xf32>
    %69 = arith.addf %66, %68 : vector<8x1xf32>
    %70 = math.rsqrt %69 : vector<8x1xf32>
    %71 = arith.mulf %67, %70 : vector<8x1xf32>
    %72 = vector.broadcast %71 : vector<8x1xf32> to vector<8x256xf32>
    %73 = arith.mulf %59, %72 : vector<8x256xf32>
    %c0_48 = arith.constant 0 : index
    %c0_49 = arith.constant 0 : index
    %74 = vector.load %arg3[%c0_48, %c0_49] : memref<8x1xf32, #tpu.memory_space<vmem>>, vector<8x1xf32>
    %75 = vector.broadcast %74 : vector<8x1xf32> to vector<8x256xf32>
    %76 = arith.addf %73, %75 : vector<8x256xf32>
    %cst_50 = arith.constant 0.000000e+00 : f32
    %77 = vector.broadcast %cst_50 : f32 to vector<8x256xf32>
    %78 = arith.maximumf %76, %77 : vector<8x256xf32>
    %c0_51 = arith.constant 0 : index
    %c128_52 = arith.constant 128 : index
    %79 = vector.load %arg9[%c0_51, %c128_52] : memref<8x512xf32, #tpu.memory_space<vmem>>, vector<8x256xf32>
    tpu.vector_store %arg9[%c0_51, %c128_52], %78 {strides = array<i32>} : memref<8x512xf32, #tpu.memory_space<vmem>>, vector<8x256xf32>,
    %c0_53 = arith.constant 0 : index
    %c111_54 = arith.constant 111 : index
    %80 = vector.load %arg9[%c0_53, %c111_54] : memref<8x512xf32, #tpu.memory_space<vmem>>, vector<8x256xf32>
    %81 = vector.broadcast %8 : vector<1x256xf32> to vector<8x256xf32>
    %82 = arith.mulf %80, %81 : vector<8x256xf32>
    %c0_55 = arith.constant 0 : index
    %c0_56 = arith.constant 0 : index
    %83 = vector.load %arg10[%c0_55, %c0_56] : memref<72x256xf32, #tpu.memory_space<vmem>>, vector<8x256xf32>
    tpu.vector_store %arg10[%c0_55, %c0_56], %82 {strides = array<i32>} : memref<72x256xf32, #tpu.memory_space<vmem>>, vector<8x256xf32>,
    %c0_57 = arith.constant 0 : index
    %c112_58 = arith.constant 112 : index
    %84 = vector.load %arg9[%c0_57, %c112_58] : memref<8x512xf32, #tpu.memory_space<vmem>>, vector<8x256xf32>
    %c8_59 = arith.constant 8 : index
    %c0_60 = arith.constant 0 : index
    %85 = vector.load %arg10[%c8_59, %c0_60] : memref<72x256xf32, #tpu.memory_space<vmem>>, vector<8x256xf32>
    tpu.vector_store %arg10[%c8_59, %c0_60], %84 {strides = array<i32>} : memref<72x256xf32, #tpu.memory_space<vmem>>, vector<8x256xf32>,
    %c0_61 = arith.constant 0 : index
    %c113_62 = arith.constant 113 : index
    %86 = vector.load %arg9[%c0_61, %c113_62] : memref<8x512xf32, #tpu.memory_space<vmem>>, vector<8x256xf32>
    %87 = vector.broadcast %13 : vector<1x256xf32> to vector<8x256xf32>
    %88 = arith.mulf %86, %87 : vector<8x256xf32>
    %c16_63 = arith.constant 16 : index
    %c0_64 = arith.constant 0 : index
    %89 = vector.load %arg10[%c16_63, %c0_64] : memref<72x256xf32, #tpu.memory_space<vmem>>, vector<8x256xf32>
    tpu.vector_store %arg10[%c16_63, %c0_64], %88 {strides = array<i32>} : memref<72x256xf32, #tpu.memory_space<vmem>>, vector<8x256xf32>,
    %c0_65 = arith.constant 0 : index
    %c127_66 = arith.constant 127 : index
    %90 = vector.load %arg9[%c0_65, %c127_66] : memref<8x512xf32, #tpu.memory_space<vmem>>, vector<8x256xf32>
    %91 = vector.broadcast %8 : vector<1x256xf32> to vector<8x256xf32>
    %92 = arith.mulf %90, %91 : vector<8x256xf32>
    %c24_67 = arith.constant 24 : index
    %c0_68 = arith.constant 0 : index
    %93 = vector.load %arg10[%c24_67, %c0_68] : memref<72x256xf32, #tpu.memory_space<vmem>>, vector<8x256xf32>
    tpu.vector_store %arg10[%c24_67, %c0_68], %92 {strides = array<i32>} : memref<72x256xf32, #tpu.memory_space<vmem>>, vector<8x256xf32>,
    %c0_69 = arith.constant 0 : index
    %c128_70 = arith.constant 128 : index
    %94 = vector.load %arg9[%c0_69, %c128_70] : memref<8x512xf32, #tpu.memory_space<vmem>>, vector<8x256xf32>
    %c32_71 = arith.constant 32 : index
    %c0_72 = arith.constant 0 : index
    %95 = vector.load %arg10[%c32_71, %c0_72] : memref<72x256xf32, #tpu.memory_space<vmem>>, vector<8x256xf32>
    tpu.vector_store %arg10[%c32_71, %c0_72], %94 {strides = array<i32>} : memref<72x256xf32, #tpu.memory_space<vmem>>, vector<8x256xf32>,
    %c0_73 = arith.constant 0 : index
    %c129_74 = arith.constant 129 : index
    %96 = vector.load %arg9[%c0_73, %c129_74] : memref<8x512xf32, #tpu.memory_space<vmem>>, vector<8x256xf32>
    %97 = vector.broadcast %13 : vector<1x256xf32> to vector<8x256xf32>
    %98 = arith.mulf %96, %97 : vector<8x256xf32>
    %c40_75 = arith.constant 40 : index
    %c0_76 = arith.constant 0 : index
    %99 = vector.load %arg10[%c40_75, %c0_76] : memref<72x256xf32, #tpu.memory_space<vmem>>, vector<8x256xf32>
    tpu.vector_store %arg10[%c40_75, %c0_76], %98 {strides = array<i32>} : memref<72x256xf32, #tpu.memory_space<vmem>>, vector<8x256xf32>,
    %c0_77 = arith.constant 0 : index
    %c143_78 = arith.constant 143 : index
    %100 = vector.load %arg9[%c0_77, %c143_78] : memref<8x512xf32, #tpu.memory_space<vmem>>, vector<8x256xf32>
    %101 = vector.broadcast %8 : vector<1x256xf32> to vector<8x256xf32>
    %102 = arith.mulf %100, %101 : vector<8x256xf32>
    %c48_79 = arith.constant 48 : index
    %c0_80 = arith.constant 0 : index
    %103 = vector.load %arg10[%c48_79, %c0_80] : memref<72x256xf32, #tpu.memory_space<vmem>>, vector<8x256xf32>
    tpu.vector_store %arg10[%c48_79, %c0_80], %102 {strides = array<i32>} : memref<72x256xf32, #tpu.memory_space<vmem>>, vector<8x256xf32>,
    %c0_81 = arith.constant 0 : index
    %c144_82 = arith.constant 144 : index
    %104 = vector.load %arg9[%c0_81, %c144_82] : memref<8x512xf32, #tpu.memory_space<vmem>>, vector<8x256xf32>
    %c56_83 = arith.constant 56 : index
    %c0_84 = arith.constant 0 : index
    %105 = vector.load %arg10[%c56_83, %c0_84] : memref<72x256xf32, #tpu.memory_space<vmem>>, vector<8x256xf32>
    tpu.vector_store %arg10[%c56_83, %c0_84], %104 {strides = array<i32>} : memref<72x256xf32, #tpu.memory_space<vmem>>, vector<8x256xf32>,
    %c0_85 = arith.constant 0 : index
    %c145_86 = arith.constant 145 : index
    %106 = vector.load %arg9[%c0_85, %c145_86] : memref<8x512xf32, #tpu.memory_space<vmem>>, vector<8x256xf32>
    %107 = vector.broadcast %13 : vector<1x256xf32> to vector<8x256xf32>
    %108 = arith.mulf %106, %107 : vector<8x256xf32>
    %c64_87 = arith.constant 64 : index
    %c0_88 = arith.constant 0 : index
    %109 = vector.load %arg10[%c64_87, %c0_88] : memref<72x256xf32, #tpu.memory_space<vmem>>, vector<8x256xf32>
    tpu.vector_store %arg10[%c64_87, %c0_88], %108 {strides = array<i32>} : memref<72x256xf32, #tpu.memory_space<vmem>>, vector<8x256xf32>,
    %c0_89 = arith.constant 0 : index
    %c0_90 = arith.constant 0 : index
    %110 = vector.load %arg4[%c0_89, %c0_90] : memref<8x72xf32, #tpu.memory_space<vmem>>, vector<8x72xf32>
    %c0_91 = arith.constant 0 : index
    %c0_92 = arith.constant 0 : index
    %111 = vector.load %arg10[%c0_91, %c0_92] : memref<72x256xf32, #tpu.memory_space<vmem>>, vector<72x256xf32>
    %cst_93 = arith.constant dense<0.000000e+00> : vector<8x256xf32>
    %112 = tpu.matmul %110, %111, %cst_93 {dimension_numbers = #tpu.dot_dimension_numbers<[1], [0], [0], [1], [0, 0, 1, 1], [], []>} : vector<8x72xf32>, vector<72x256xf32>, vector<8x256xf32> -> vector<8x256xf32>
    %c0_94 = arith.constant 0 : index
    %c0_95 = arith.constant 0 : index
    %113 = vector.load %arg7[%c0_94, %c0_95] : memref<8x8xf32, #tpu.memory_space<vmem>>, vector<8x8xf32>
    %cst_96 = arith.constant dense<0.000000e+00> : vector<8x256xf32>
    %114 = tpu.matmul %113, %112, %cst_96 {dimension_numbers = #tpu.dot_dimension_numbers<[1], [0], [0], [1], [0, 0, 1, 1], [], []>} : vector<8x8xf32>, vector<8x256xf32>, vector<8x256xf32> -> vector<8x256xf32>
    %cst_97 = arith.constant dense<0.000000e+00> : vector<8xf32>
    %115 = vector.multi_reduction <add>, %114, %cst_97 [1] : vector<8x256xf32> to vector<8xf32>
    %116 = vector.shape_cast %115 : vector<8xf32> to vector<8x1xf32>
    %cst_98 = arith.constant 0.001953125 : f32
    %117 = vector.broadcast %cst_98 : f32 to vector<8x1xf32>
    %118 = arith.mulf %116, %117 : vector<8x1xf32>
    %119 = vector.broadcast %118 : vector<8x1xf32> to vector<8x256xf32>
    %120 = arith.subf %112, %119 : vector<8x256xf32>
    %c0_99 = arith.constant 0 : index
    %c0_100 = arith.constant 0 : index
    %121 = vector.load %arg7[%c0_99, %c0_100] : memref<8x8xf32, #tpu.memory_space<vmem>>, vector<8x8xf32>
    %122 = arith.mulf %120, %120 : vector<8x256xf32>
    %cst_101 = arith.constant dense<0.000000e+00> : vector<8x256xf32>
    %123 = tpu.matmul %121, %122, %cst_101 {dimension_numbers = #tpu.dot_dimension_numbers<[1], [0], [0], [1], [0, 0, 1, 1], [], []>} : vector<8x8xf32>, vector<8x256xf32>, vector<8x256xf32> -> vector<8x256xf32>
    %cst_102 = arith.constant dense<0.000000e+00> : vector<8xf32>
    %124 = vector.multi_reduction <add>, %123, %cst_102 [1] : vector<8x256xf32> to vector<8xf32>
    %125 = vector.shape_cast %124 : vector<8xf32> to vector<8x1xf32>
    %cst_103 = arith.constant 0.001953125 : f32
    %126 = vector.broadcast %cst_103 : f32 to vector<8x1xf32>
    %127 = arith.mulf %125, %126 : vector<8x1xf32>
    %c0_104 = arith.constant 0 : index
    %c0_105 = arith.constant 0 : index
    %128 = vector.load %arg5[%c0_104, %c0_105] : memref<8x1xf32, #tpu.memory_space<vmem>>, vector<8x1xf32>
    %cst_106 = arith.constant 9.99999974E-6 : f32
    %129 = vector.broadcast %cst_106 : f32 to vector<8x1xf32>
    %130 = arith.addf %127, %129 : vector<8x1xf32>
    %131 = math.rsqrt %130 : vector<8x1xf32>
    %132 = arith.mulf %128, %131 : vector<8x1xf32>
    %133 = vector.broadcast %132 : vector<8x1xf32> to vector<8x256xf32>
    %134 = arith.mulf %120, %133 : vector<8x256xf32>
    %c0_107 = arith.constant 0 : index
    %c0_108 = arith.constant 0 : index
    %135 = vector.load %arg6[%c0_107, %c0_108] : memref<8x1xf32, #tpu.memory_space<vmem>>, vector<8x1xf32>
    %136 = vector.broadcast %135 : vector<8x1xf32> to vector<8x256xf32>
    %137 = arith.addf %134, %136 : vector<8x256xf32>
    %138 = arith.addf %0, %137 : vector<8x256xf32>
    %cst_109 = arith.constant 0.000000e+00 : f32
    %139 = vector.broadcast %cst_109 : f32 to vector<8x256xf32>
    %140 = arith.maximumf %138, %139 : vector<8x256xf32>
    %c0_110 = arith.constant 0 : index
    %c0_111 = arith.constant 0 : index
    %141 = vector.load %arg8[%c0_110, %c0_111] : memref<8x256xf32, #tpu.memory_space<vmem>>, vector<8x256xf32>
    tpu.vector_store %arg8[%c0_110, %c0_111], %140 {strides = array<i32>} : memref<8x256xf32, #tpu.memory_space<vmem>>, vector<8x256xf32>,
    return
  }
}

</mosaic_0001>

<bundles_post_ra>
// kernel: tile.18
= control target key start
LH: loop header
LB: loop body
LE: loop exit
PB: predicated region body
PF: predicated region fallthrough
CT: control target
= control target key end

     0   :  { %s22_s0 = inlined_call_operand.vmem [shape: f32[4], index: 0, kind: input, shape index: {}]   ;;  %s23_s1 = inlined_call_operand.vmem [shape: f32[2,1,1,4], index: 1, kind: output, shape index: {}]  }
   0x1   :  { %v4_v0 = vld [vmem:[%s22_s0] ss:$0 sm:$0xff] }
   0x2   :  { %5 = vst [vmem:[%s23_s1] sm:$0x3] %v4_v0 }

// kernel: tile.0
= control target key start
LH: loop header
LB: loop body
LE: loop exit
PB: predicated region body
PF: predicated region fallthrough
CT: control target
= control target key end

     0   :  { %s34_s8 = smov 125   ;;  %vm7_vm0 = vcmask 7168   ;;  %s35_s11 = smov 126   ;;  %s61_s0 = inlined_call_operand.vmem [shape: f32[2,1,1,4], index: 0, kind: input, shape index: {}]   ;;  %s62_s1 = inlined_call_operand.vmem [shape: f32[8,1], index: 1, kind: output, shape index: {}]  }
   0x1   :  { %v4_v0 = vld [vmem:[%s61_s0] sm:$0x3]  ;;  %s33_s0 = smov 127  }
   0x2   :  { %5 = vst [vmem:[#allocation0] sm:$0x3] %v4_v0 }
   0x9   :  { %v9_v1 = vld [vmem:[#allocation0] sm:$0x3]  }
   0xa   :  { %v21_v2 = vld [vmem:[#allocation0] sm:$0x3]   ;;  %10 = vrot.lane.b32.xlu0 %v9_v1, %s33_s0 }
   0xb   :  { %22 = vrot.lane.b32.xlu1 %v21_v2, %s34_s8  ;;  %v6_v3 = vld [vmem:[#allocation0] sm:$0x3]  }
   0xc   :  { %v15_v4 = vld [vmem:[#allocation0] sm:$0x3]   ;;  %8 = vst.msk [vmem:[%s62_s1] ss:$4 sm:$0x3] %vm7_vm0, %v6_v3  }
   0xe   :  { %16 = vrot.lane.b32.xlu0 %v15_v4, %s35_s11 }
  0x7c   :  { %v11_v5 = vpop.permute.xlu0 %10  }
  0x7d   :  { %v23_v6 = vpop.permute.xlu1 %22   ;;  %27 = vst.msk [vmem:[%s62_s1 + $0x1] ss:$4 sm:$0x3] %vm7_vm0, %v11_v5  }
  0x7e   :  { %29 = vst.msk [vmem:[%s62_s1 + $0x3] ss:$4 sm:$0x3] %vm7_vm0, %v23_v6  }
  0x80   :  { %v17_v7 = vpop.permute.xlu0 %16  }
  0x81   :  { %28 = vst.msk [vmem:[%s62_s1 + $0x2] ss:$4 sm:$0x3] %vm7_vm0, %v17_v7  }

// kernel: conv2block_forward.1
= control target key start
LH: loop header
LB: loop body
LE: loop exit
PB: predicated region body
PF: predicated region fallthrough
CT: control target
= control target key end

     0   :  { %v31_v0 = vlaneseq  ;;  %v1150_v1 = vmov 0.0   ;;  %s1151_s27 = smov 111   ;;  %s1152_s28 = smov 127   ;;  %vm57_vm4 = vcmask 908288   ;;  %vm140_vm5 = vcmask 1039360   ;;  %s1466_s0 = inlined_call_operand.vmem [shape: f32[8,256], index: 0, kind: input, shape index: {}]   ;;  %s1467_s1 = inlined_call_operand.vmem [shape: f32[8,72], index: 1, kind: input, shape index: {}]   ;;  %s1468_s7 = inlined_call_operand.vmem [shape: f32[8,8], index: 7, kind: input, shape index: {}]   ;;  %s1469_s3 = inlined_call_operand.vmem [shape: f32[8,1], index: 3, kind: input, shape index: {}]   ;;  %s1470_s2 = inlined_call_operand.vmem [shape: f32[8,1], index: 2, kind: input, shape index: {}]   ;;  %s1471_s4 = inlined_call_operand.vmem [shape: f32[8,72], index: 4, kind: input, shape index: {}]   ;;  %s1472_s6 = inlined_call_operand.vmem [shape: f32[8,1], index: 6, kind: input, shape index: {}]   ;;  %s1473_s5 = inlined_call_operand.vmem [shape: f32[8,1], index: 5, kind: input, shape index: {}]   ;;  %s1474_s8 = inlined_call_operand.vmem [shape: f32[8,256], index: 8, kind: output, shape index: {}]  }
   0x1   :  { %361 = vmatprep.mubr.f32.mxu0 %v1150_v1  ;;  %437 = vmatprep.mubr.f32.mxu1 %v1150_v1  ;;  %s1153_s29 = smov 113   ;;  %s1154_s30 = smov 1   ;;  %v1218_v12 = vld [vmem:[%s1466_s0] sm:$0xff]  ;;  %v1223_v13 = vld [vmem:[%s1466_s0 + $0x8] sm:$0xff]  ;;  %vm109_vm6 = vcmask 924672   ;;  %vm157_vm7 = vcmask 7168  }
   0x2   :  { %v32_v2 = vand.u32 127, %v31_v0  ;;  %s1155_s13 = smov 15   ;;  %s1156_s14 = smov 17   ;;  %v1074_v14 = vpack.i.bf16 %v1223_v13, %v1218_v12  ;;  %v1094_v44 = vpack.i.bf16 %v1150_v1, %v1223_v13  ;;  %vm126_vm8 = vcmask 121856  }
   0x3   :  { %s1157_s15 = smov 16   ;;  %s1158_s0 = smov 112   ;;  %vm74_vm9 = vcmask 138240   ;;  %vm93_vm10 = vcmask 130048   ;;  %vm238_vm11 = vcmask 916480   ;;  %vm293_vm12 = vcmask 588800  }
   0x4   :  { %v33_v3 = vadd.s32 128, %v32_v2  ;;  %v34_v4 = vand.u32 15, %v32_v2  ;;  %vm369_vm13 = vcmask 64512  }
   0x6   :  { %v35_v5 = vand.u32 15, %v33_v3  ;;  %vm36_vm0 = vcmp.ge.s32.totalorder %v34_v4, 1  ;;  %vm40_vm1 = vcmp.le.s32.totalorder %v34_v4, 14 }
   0x7   :  { %v38_v6 = vsel %vm36_vm0, 1.0, %v1150_v1  ;;  %v42_v8 = vsel %vm40_vm1, 1.0, %v1150_v1 }
   0x8   :  { %vm37_vm2 = vcmp.ge.s32.totalorder %v35_v5, 1  ;;  %vm41_vm3 = vcmp.le.s32.totalorder %v35_v5, 14 }
   0x9   :  { %v39_v7 = vsel %vm37_vm2, 1.0, %v1150_v1  ;;  %v43_v9 = vsel %vm41_vm3, 1.0, %v1150_v1 }
   0xa   :  { %v1044_v10 = vpack.i.bf16 %v39_v7, %v38_v6  ;;  %v1049_v11 = vpack.i.bf16 %v43_v9, %v42_v8 }
   0xc   :  { %1045 = vrot.lane.b32.xlu0 %v1044_v10, %s1151_s27  ;;  %1055 = vrot.lane.b32.xlu1 %v1044_v10, %s1152_s28 }
  0x10   :  { %1050 = vrot.lane.b32.xlu0 %v1049_v11, %s1153_s29  ;;  %1060 = vrot.lane.b32.xlu1 %v1049_v11, %s1154_s30 }
  0x14   :  { %1065 = vrot.lane.b32.xlu0 %v1044_v10, %s1155_s13  ;;  %1070 = vrot.lane.b32.xlu1 %v1049_v11, %s1156_s14 }
  0x18   :  { %1075 = vrot.lane.b32.xlu1 %v1074_v14, %s1157_s15 }
  0x1c   :  { %87 = vrot.lane.b32.xlu1 %v1150_v1, %s1157_s15 }
  0x7e   :  { %v1046_v15 = vpop.permute.xlu0 %1045  ;;  %v1056_v16 = vpop.permute.xlu1 %1055 }
  0x7f   :  { %v1232_v17 = vunpack.i.h.bf16 %v1046_v15  ;;  %v1047_v18 = vunpack.i.l.bf16 %v1046_v15  ;;  %v1234_v19 = vunpack.i.h.bf16 %v1056_v16  ;;  %v1057_v20 = vunpack.i.l.bf16 %v1056_v16 }
  0x81   :  { %v1236_v21 = vmul.f32 0.0, %v1047_v18  ;;  %v1240_v22 = vsel %vm140_vm5, %v1057_v20, %v1234_v19  ;;  %v1242_v23 = vmul.f32 0.0, %v1057_v20  ;;  %v1246_v24 = vsel %vm57_vm4, %v1047_v18, %v1232_v17 }
  0x82   :  { %v1051_v25 = vpop.permute.xlu0 %1050  ;;  %v146_v26 = vmul.f32 %v1240_v22, %v1218_v12  ;;  %v147_v27 = vmul.f32 %v1234_v19, %v1223_v13  ;;  %v1061_v28 = vpop.permute.xlu1 %1060  ;;  %v63_v34 = vmul.f32 %v1246_v24, %v1218_v12  ;;  %v64_v35 = vmul.f32 %v1232_v17, %v1223_v13 }
  0x83   :  { %v1252_v29 = vunpack.i.h.bf16 %v1051_v25  ;;  %v1052_v30 = vunpack.i.l.bf16 %v1051_v25  ;;  %68 = vrot.lane.b32.xlu0 %v1236_v21, %s1156_s14  ;;  %151 = vrot.lane.b32.xlu1 %v1242_v23, %s1154_s30  ;;  %v1258_v31 = vunpack.i.l.bf16 %v1061_v28  ;;  %v1063_v39 = vunpack.i.h.bf16 %v1061_v28 }
  0x84   :  { %v1089_v32 = vpack.i.bf16 %v147_v27, %v146_v26  ;;  %v1079_v40 = vpack.i.bf16 %v64_v35, %v63_v34 }
  0x85   :  { %v1260_v33 = vmul.f32 0.0, %v1052_v30  ;;  %v1268_v36 = vsel %vm109_vm6, %v1052_v30, %v1252_v29  ;;  %v179_v37 = vmul.f32 %v1258_v31, %v1218_v12  ;;  %v116_v42 = vmul.f32 %v1252_v29, %v1223_v13 }
  0x86   :  { %v1066_v38 = vpop.permute.xlu0 %1065  ;;  %v115_v41 = vmul.f32 %v1268_v36, %v1218_v12  ;;  %v1287_v45 = vsel %vm157_vm7, %v1258_v31, %v1063_v39  ;;  %v1071_v46 = vpop.permute.xlu1 %1070  ;;  %v1289_v49 = vmul.f32 0.0, %v1063_v39 }
  0x87   :  { %120 = vrot.lane.b32.xlu0 %v1260_v33, %s1155_s13  ;;  %1090 = vrot.lane.b32.xlu1 %v1089_v32, %s1154_s30  ;;  %v1280_v43 = vunpack.i.l.bf16 %v1066_v38  ;;  %v1068_v48 = vunpack.i.h.bf16 %v1066_v38  ;;  %v180_v51 = vmul.f32 %v1287_v45, %v1223_v13  ;;  %v1073_v52 = vunpack.i.h.bf16 %v1071_v46 }
  0x88   :  { %v1084_v47 = vpack.i.bf16 %v116_v42, %v115_v41  ;;  %v1307_v56 = vunpack.i.l.bf16 %v1071_v46 }
  0x89   :  { %v208_v50 = vmul.f32 %v1280_v43, %v1218_v12  ;;  %v1299_v53 = vsel %vm126_vm8, %v1280_v43, %v1068_v48  ;;  %v1099_v54 = vpack.i.bf16 %v1289_v49, %v180_v51  ;;  %v1303_v55 = vmul.f32 0.0, %v1073_v52 }
  0x8a   :  { %v1309_v57 = vmul.f32 0.0, %v1068_v48  ;;  %v209_v58 = vmul.f32 %v1299_v53, %v1223_v13  ;;  %v1318_v59 = vsel %vm74_vm9, %v1307_v56, %v1073_v52  ;;  %v256_v62 = vmul.f32 %v1307_v56, %v1218_v12  ;;  %v1076_v63 = vpop.permute.xlu1 %1075 }
  0x8b   :  { %1080 = vrot.lane.b32.xlu0 %v1079_v40, %s1156_s14  ;;  %185 = vrot.lane.b32.xlu1 %v179_v37, %s1152_s28  ;;  %v257_v61 = vmul.f32 %v1318_v59, %v1223_v13  ;;  %v1078_v5 = vunpack.i.h.bf16 %v1076_v63  ;;  %v1077_v6 = vunpack.i.l.bf16 %v1076_v63 }
  0x8c   :  { %v1104_v60 = vpack.i.bf16 %v1309_v57, %v209_v58 }
  0x8d   :  { %v95_v14 = vsel %vm93_vm10, %v1077_v6, %v1078_v5 }
  0x8e   :  { %v88_v0 = vpop.permute.xlu1 %87 }
  0x8f   :  { %1085 = vrot.lane.b32.xlu0 %v1084_v47, %s1155_s13  ;;  %1095 = vrot.lane.b32.xlu1 %v1094_v44, %s1158_s0  ;;  %v94_v16 = vsel %vm93_vm10, %v88_v0, %v1077_v6 }
  0x93   :  { %214 = vrot.lane.b32.xlu0 %v208_v50, %s1153_s29  ;;  %232 = vrot.lane.b32.xlu1 %v1218_v12, %s1158_s0 }
  0x97   :  { %1100 = vrot.lane.b32.xlu0 %v1099_v54, %s1152_s28  ;;  %266 = vrot.lane.b32.xlu1 %v1303_v55, %s1151_s27 }
  0x9b   :  { %1105 = vrot.lane.b32.xlu0 %v1104_v60, %s1153_s29 }
  0x9f   :  { %264 = vrot.lane.b32.xlu0 %v257_v61, %s1151_s27 }
  0xa3   :  { %262 = vrot.lane.b32.xlu0 %v256_v62, %s1151_s27 }
  0xf5   :  { %v69_v2 = vpop.permute.xlu0 %68  ;;  %v152_v3 = vpop.permute.xlu1 %151 }
  0xf9   :  { %v121_v4 = vpop.permute.xlu0 %120  ;;  %v1091_v7 = vpop.permute.xlu1 %1090 }
  0xfa   :  { %v1093_v11 = vunpack.i.h.bf16 %v1091_v7  ;;  %v1092_v18 = vunpack.i.l.bf16 %v1091_v7 }
  0xfc   :  { %v159_v34 = vsel %vm157_vm7, %v1092_v18, %v1093_v11  ;;  %v158_v38 = vsel %vm157_vm7, %v152_v3, %v1092_v18  ;;  %v1354_v18 = vld [vmem:[%s1468_s7] sm:$0xff] }
  0xfd   :  { %v1081_v8 = vpop.permute.xlu0 %1080  ;;  %v186_v15 = vpop.permute.xlu1 %185 }
  0xfe   :  { %v1083_v9 = vunpack.i.h.bf16 %v1081_v8  ;;  %v1082_v10 = vunpack.i.l.bf16 %v1081_v8 }
 0x100   :  { %v76_v20 = vsel %vm74_vm9, %v1082_v10, %v1083_v9  ;;  %v75_v25 = vsel %vm74_vm9, %v69_v2, %v1082_v10 }
 0x101   :  { %v1086_v26 = vpop.permute.xlu0 %1085  ;;  %v1002_v27 = vpack.c.bf16 %v95_v14, %v76_v20  ;;  %v1004_v28 = vpack.c.bf16 %v94_v16, %v75_v25  ;;  %v1096_v42 = vpop.permute.xlu1 %1095  ;;  %v274_v14 = vld [vmem:[%s1467_s1] sm:$0xff]  ;;  %v1159_v20 = vmov 0  }
 0x102   :  { %v1088_v30 = vunpack.i.h.bf16 %v1086_v26  ;;  %v1087_v32 = vunpack.i.l.bf16 %v1086_v26  ;;  %v1098_v46 = vunpack.i.h.bf16 %v1096_v42  ;;  %v1097_v47 = vunpack.i.l.bf16 %v1096_v42  ;;  %1110 = vset.pattern.permute.xlu1 %v1159_v20  ;;  %1109 = vset.pattern.permute.xlu0 %v1159_v20 }
 0x103   :  { %1003 = vmatprep.subr.bf16.mxu0 %v1002_v27 }
 0x104   :  { %1005 = vmatpush1.bf16.msra.mxu0 %v1004_v28  ;;  %v128_v35 = vsel %vm126_vm8, %v1087_v32, %v1088_v30  ;;  %v127_v37 = vsel %vm126_vm8, %v121_v4, %v1087_v32  ;;  %v240_v2 = vsel %vm238_vm11, %v1097_v47, %v1098_v46  ;;  %v538_v28 = vld [vmem:[%s1469_s3] sm:$0xff] }
 0x105   :  { %v215_v39 = vpop.permute.xlu0 %214  ;;  %v1006_v40 = vpack.c.bf16 %v159_v34, %v128_v35  ;;  %v1008_v41 = vpack.c.bf16 %v158_v38, %v127_v37  ;;  %v233_v51 = vpop.permute.xlu1 %232 }
 0x106   :  { %v239_v62 = vsel %vm238_vm11, %v233_v51, %v1097_v47 }
 0x107   :  { %1007 = vmatprep.subr.bf16.mxu0 %v1006_v40 }
 0x108   :  { %1009 = vmatpush1.bf16.msra.mxu0 %v1008_v41 }
 0x109   :  { %v1101_v44 = vpop.permute.xlu0 %1100  ;;  %v267_v5 = vpop.permute.xlu1 %266 }
 0x10a   :  { %v1103_v48 = vunpack.i.h.bf16 %v1101_v44  ;;  %v1102_v50 = vunpack.i.l.bf16 %v1101_v44  ;;  %v527_v44 = vld [vmem:[%s1470_s2] sm:$0xff] }
 0x10c   :  { %v192_v52 = vsel %vm140_vm5, %v1102_v50, %v1103_v48  ;;  %v191_v54 = vsel %vm140_vm5, %v186_v15, %v1102_v50 }
 0x10d   :  { %v1106_v58 = vpop.permute.xlu0 %1105  ;;  %v1010_v60 = vpack.c.bf16 %v192_v52, %v1223_v13  ;;  %v1012_v61 = vpack.c.bf16 %v191_v54, %v1218_v12 }
 0x10e   :  { %v1108_v63 = vunpack.i.h.bf16 %v1106_v58  ;;  %v1107_v0 = vunpack.i.l.bf16 %v1106_v58 }
 0x10f   :  { %1011 = vmatprep.subr.bf16.mxu0 %v1010_v60 }
 0x110   :  { %1013 = vmatpush1.bf16.msra.mxu0 %v1012_v61  ;;  %v221_v3 = vsel %vm109_vm6, %v1107_v0, %v1108_v63  ;;  %v220_v4 = vsel %vm109_vm6, %v215_v39, %v1107_v0 }
 0x111   :  { %v265_v6 = vpop.permute.xlu0 %264  ;;  %v1014_v7 = vpack.c.bf16 %v240_v2, %v221_v3  ;;  %v1016_v8 = vpack.c.bf16 %v239_v62, %v220_v4 }
 0x112   :  { %v269_v9 = vsel %vm57_vm4, %v265_v6, %v267_v5 }
 0x113   :  { %1015 = vmatprep.subr.bf16.mxu0 %v1014_v7 }
 0x114   :  { %1017 = vmatpush1.bf16.msra.mxu0 %v1016_v8 }
 0x115   :  { %v263_v10 = vpop.permute.xlu0 %262  ;;  %313 = vmatprep.subr.mxu0 %v269_v9 }
 0x116   :  { %v268_v11 = vsel %vm57_vm4, %v263_v10, %v265_v6 }
 0x118   :  { %314 = vmatpush1.msra.mxu0 %v268_v11 }
 0x119   :  { %996 = vmatmul.mubr.msk.f32.vlgmr.msra.gmra.mrb[0].mxu0 %vm293_vm12, %v274_v14 }
 0x11a   :  { %877 = vmatprep.mubr.f32.mxu0 %v1150_v1 }
 0x1ec   :  { %v363_v15 = vpop.f32.mrb[0].mxu0 }
 0x1ed   :  { %v365_v16 = vpop.f32.mrb[1].mxu0 }
 0x1ee   :  { %373 = vmatprep.subr.mxu1 %v365_v16 }
 0x1ef   :  { %374 = vmatpush1.msra.mxu1 %v363_v15 }
 0x1f0   :  { %997 = vmatmul.mubr.msk.f32.vlgmr.msra.gmra.mrb[0].mxu1 %vm369_vm13, %v1354_v18 }
 0x1f1   :  { %516 = vmatprep.mubr.f32.mxu1 %v1150_v1 }
 0x2c3   :  { %v439_v25 = vpop.f32.mrb[0].mxu1 }
 0x2c4   :  { %v441_v26 = vpop.f32.mrb[1].mxu1 }
 0x2c5   :  { %v444_v27 = vadd.f32 %v441_v26, %v439_v25 }
 0x2c7   :  { %445 = vadd.xlane.f32.xlu1 %v444_v27 }
 0x2d8   :  { %541 = vperm.xlu1 %1110, %v538_v28  }
 0x2dc   :  { %559 = vrot.lane.b32.xlu1 %v1236_v21, %s1156_s14 }
 0x2e0   :  { %577 = vrot.lane.b32.xlu1 %v1150_v1, %s1157_s15 }
 0x2e4   :  { %598 = vrot.lane.b32.xlu1 %v1260_v33, %s1155_s13 }
 0x354   :  { %v446_v30 = vpop.xlane.xlu1 %445 }
 0x355   :  { %v447_v32 = vmul.f32 0.001953125, %v446_v30 }
 0x357   :  { %v448_v34 = vsub.f32 %v363_v15, %v447_v32  ;;  %v449_v35 = vsub.f32 %v365_v16, %v447_v32 }
 0x358   :  { %v542_v52 = vpop.permute.xlu1 %541 }
 0x359   :  { %v450_v37 = vmul.f32 %v448_v34, %v448_v34  ;;  %v451_v38 = vmul.f32 %v449_v35, %v449_v35 }
 0x35b   :  { %452 = vmatprep.subr.mxu1 %v451_v38 }
 0x35c   :  { %453 = vmatpush1.msra.mxu1 %v450_v37 }
 0x35d   :  { %998 = vmatmul.mubr.msk.f32.vlgmr.msra.gmra.mrb[2].mxu1 %vm369_vm13, %v1354_v18 }
 0x35e   :  { %802 = vmatprep.mubr.f32.mxu1 %v1150_v1 }
 0x430   :  { %v518_v21 = vpop.f32.mrb[2].mxu1 }
 0x431   :  { %v520_v39 = vpop.f32.mrb[3].mxu1 }
 0x432   :  { %v523_v40 = vadd.f32 %v520_v39, %v518_v21 }
 0x434   :  { %524 = vadd.xlane.f32.xlu0 %v523_v40 }
 0x4c1   :  { %v525_v41 = vpop.xlane.xlu0 %524 }
 0x4c2   :  { %v526_v42 = vmul.f32 0.001953125, %v525_v41 }
 0x4c4   :  { %v528_v33 = vadd.f32 1e-05, %v526_v42 }
 0x4c6   :  { %1146 = vrsqrt.f32 %v528_v33 }
 0x4d0   :  { %v1147_v46 = vpop.eup %1146 }
 0x4d1   :  { %v530_v47 = vmul.f32 %v1147_v46, %v527_v44 }
 0x4d3   :  { %533 = vperm.xlu0 %1109, %v530_v47  }
 0x4d7   :  { %619 = vrot.lane.b32.xlu0 %v1242_v23, %s1154_s30 }
 0x552   :  { %v534_v48 = vpop.permute.xlu0 %533 }
 0x553   :  { %v536_v50 = vmul.f32 %v534_v48, %v448_v34  ;;  %v537_v51 = vmul.f32 %v534_v48, %v449_v35 }
 0x555   :  { %v544_v54 = vadd.f32 %v542_v52, %v536_v50  ;;  %v545_v58 = vadd.f32 %v542_v52, %v537_v51 }
 0x556   :  { %v620_v15 = vpop.permute.xlu0 %619 }
 0x557   :  { %v1376_v60 = vmax.f32 %v544_v54, 0.0  ;;  %v1378_v61 = vmax.f32 %v545_v58, 0.0 }
 0x559   :  { %v1116_v62 = vpack.i.bf16 %v1150_v1, %v1378_v61  ;;  %v1111_v63 = vpack.i.bf16 %v1378_v61, %v1376_v60  ;;  %v554_v0 = vmul.f32 %v1376_v60, %v1246_v24  ;;  %v555_v23 = vmul.f32 %v1232_v17, %v1378_v61 }
 0x55a   :  { %v638_v2 = vmul.f32 %v1258_v31, %v1376_v60  ;;  %v593_v4 = vmul.f32 %v1376_v60, %v1268_v36  ;;  %v594_v5 = vmul.f32 %v1252_v29, %v1378_v61  ;;  %v614_v17 = vmul.f32 %v1376_v60, %v1240_v22 }
 0x55b   :  { %1117 = vrot.lane.b32.xlu0 %v1116_v62, %s1158_s0  ;;  %1112 = vrot.lane.b32.xlu1 %v1111_v63, %s1157_s15  ;;  %v1121_v3 = vpack.i.bf16 %v555_v23, %v554_v0  ;;  %v615_v6 = vmul.f32 %v1234_v19, %v1378_v61  ;;  %v639_v29 = vmul.f32 %v1378_v61, %v1287_v45 }
 0x55c   :  { %v1126_v24 = vpack.i.bf16 %v594_v5, %v593_v4  ;;  %v660_v22 = vmul.f32 %v1378_v61, %v1299_v53  ;;  %v659_v7 = vmul.f32 %v1280_v43, %v1376_v60  ;;  %v699_v45 = vmul.f32 %v1378_v61, %v1318_v59  ;;  %v560_v53 = vpop.permute.xlu1 %559 }
 0x55d   :  { %v1131_v31 = vpack.i.bf16 %v615_v6, %v614_v17  ;;  %v1136_v36 = vpack.i.bf16 %v1289_v49, %v639_v29  ;;  %v698_v49 = vmul.f32 %v1307_v56, %v1376_v60 }
 0x55e   :  { %v1141_v19 = vpack.i.bf16 %v1309_v57, %v660_v22 }
 0x55f   :  { %644 = vrot.lane.b32.xlu0 %v638_v2, %s1152_s28  ;;  %1122 = vrot.lane.b32.xlu1 %v1121_v3, %s1156_s14 }
 0x563   :  { %683 = vrot.lane.b32.xlu0 %v1376_v60, %s1158_s0  ;;  %1127 = vrot.lane.b32.xlu1 %v1126_v24, %s1155_s13 }
 0x567   :  { %708 = vrot.lane.b32.xlu0 %v1303_v55, %s1151_s27  ;;  %1132 = vrot.lane.b32.xlu1 %v1131_v31, %s1154_s30  ;;  %v578_v55 = vpop.permute.xlu1 %577 }
 0x56b   :  { %1137 = vrot.lane.b32.xlu1 %v1136_v36, %s1152_s28  ;;  %v599_v57 = vpop.permute.xlu1 %598  ;;  %v716_v36 = vld [vmem:[%s1471_s4] sm:$0xff] }
 0x56f   :  { %1142 = vrot.lane.b32.xlu1 %v1141_v19, %s1153_s29 }
 0x573   :  { %665 = vrot.lane.b32.xlu1 %v659_v7, %s1153_s29 }
 0x577   :  { %706 = vrot.lane.b32.xlu1 %v699_v45, %s1151_s27 }
 0x57b   :  { %704 = vrot.lane.b32.xlu1 %v698_v49, %s1151_s27 }
 0x5cd   :  { %v1113_v8 = vpop.permute.xlu1 %1112  ;;  %v1118_v28 = vpop.permute.xlu0 %1117 }
 0x5ce   :  { %v1115_v9 = vunpack.i.h.bf16 %v1113_v8  ;;  %v1114_v10 = vunpack.i.l.bf16 %v1113_v8  ;;  %v1120_v48 = vunpack.i.h.bf16 %v1118_v28  ;;  %v1119_v50 = vunpack.i.l.bf16 %v1118_v28 }
 0x5d0   :  { %v583_v16 = vsel %vm93_vm10, %v578_v55, %v1114_v10  ;;  %v584_v56 = vsel %vm93_vm10, %v1114_v10, %v1115_v9  ;;  %v690_v3 = vsel %vm238_vm11, %v1119_v50, %v1120_v48 }
 0x5d1   :  { %v1123_v11 = vpop.permute.xlu1 %1122  ;;  %v645_v41 = vpop.permute.xlu0 %644 }
 0x5d2   :  { %v1125_v43 = vunpack.i.h.bf16 %v1123_v11  ;;  %v1124_v14 = vunpack.i.l.bf16 %v1123_v11 }
 0x5d4   :  { %v565_v59 = vsel %vm74_vm9, %v560_v53, %v1124_v14  ;;  %v566_v20 = vsel %vm74_vm9, %v1124_v14, %v1125_v43 }
 0x5d5   :  { %v1020_v25 = vpack.c.bf16 %v583_v16, %v565_v59  ;;  %v1128_v26 = vpop.permute.xlu1 %1127  ;;  %v1018_v27 = vpack.c.bf16 %v584_v56, %v566_v20  ;;  %v684_v23 = vpop.permute.xlu0 %683  ;;  %v967_v56 = vld [vmem:[%s1473_s5] sm:$0xff] }
 0x5d6   :  { %v1130_v30 = vunpack.i.h.bf16 %v1128_v26  ;;  %v1129_v32 = vunpack.i.l.bf16 %v1128_v26  ;;  %v689_v24 = vsel %vm238_vm11, %v684_v23, %v1119_v50 }
 0x5d7   :  { %1019 = vmatprep.subr.bf16.mxu1 %v1018_v27 }
 0x5d8   :  { %1021 = vmatpush1.bf16.msra.mxu1 %v1020_v25  ;;  %v604_v38 = vsel %vm126_vm8, %v599_v57, %v1129_v32  ;;  %v605_v39 = vsel %vm126_vm8, %v1129_v32, %v1130_v30 }
 0x5d9   :  { %v1133_v34 = vpop.permute.xlu1 %1132 }
 0x5da   :  { %v1135_v35 = vunpack.i.h.bf16 %v1133_v34  ;;  %v1134_v37 = vunpack.i.l.bf16 %v1133_v34 }
 0x5dc   :  { %v625_v21 = vsel %vm157_vm7, %v620_v15, %v1134_v37  ;;  %v626_v40 = vsel %vm157_vm7, %v1134_v37, %v1135_v35 }
 0x5dd   :  { %v1024_v42 = vpack.c.bf16 %v625_v21, %v604_v38  ;;  %v1138_v33 = vpop.permute.xlu1 %1137  ;;  %v1022_v44 = vpack.c.bf16 %v626_v40, %v605_v39 }
 0x5de   :  { %v1140_v46 = vunpack.i.h.bf16 %v1138_v33  ;;  %v1139_v47 = vunpack.i.l.bf16 %v1138_v33 }
 0x5df   :  { %1023 = vmatprep.subr.bf16.mxu1 %v1022_v44 }
 0x5e0   :  { %v650_v51 = vsel %vm140_vm5, %v645_v41, %v1139_v47  ;;  %1025 = vmatpush1.bf16.msra.mxu1 %v1024_v42  ;;  %v651_v52 = vsel %vm140_vm5, %v1139_v47, %v1140_v46 }
 0x5e1   :  { %v1028_v54 = vpack.c.bf16 %v650_v51, %v1376_v60  ;;  %v1143_v58 = vpop.permute.xlu1 %1142  ;;  %v1026_v62 = vpack.c.bf16 %v651_v52, %v1378_v61  ;;  %v709_v60 = vpop.permute.xlu0 %708 }
 0x5e2   :  { %v1145_v63 = vunpack.i.h.bf16 %v1143_v58  ;;  %v1144_v0 = vunpack.i.l.bf16 %v1143_v58 }
 0x5e3   :  { %1027 = vmatprep.subr.bf16.mxu1 %v1026_v62 }
 0x5e4   :  { %1029 = vmatpush1.bf16.msra.mxu1 %v1028_v54  ;;  %v672_v2 = vsel %vm109_vm6, %v1144_v0, %v1145_v63 }
 0x5e5   :  { %v666_v4 = vpop.permute.xlu1 %665  ;;  %v1030_v5 = vpack.c.bf16 %v690_v3, %v672_v2 }
 0x5e6   :  { %v671_v17 = vsel %vm109_vm6, %v666_v4, %v1144_v0 }
 0x5e7   :  { %v1032_v6 = vpack.c.bf16 %v689_v24, %v671_v17  ;;  %1031 = vmatprep.subr.bf16.mxu1 %v1030_v5 }
 0x5e9   :  { %v707_v31 = vpop.permute.xlu1 %706  ;;  %1033 = vmatpush1.bf16.msra.mxu1 %v1032_v6 }
 0x5ea   :  { %v711_v61 = vsel %vm57_vm4, %v707_v31, %v709_v60 }
 0x5eb   :  { %754 = vmatprep.subr.mxu1 %v711_v61 }
 0x5ed   :  { %v705_v29 = vpop.permute.xlu1 %704 }
 0x5ee   :  { %v710_v22 = vsel %vm57_vm4, %v705_v29, %v707_v31 }
 0x5ef   :  { %755 = vmatpush1.msra.mxu1 %v710_v22 }
 0x5f0   :  { %999 = vmatmul.mubr.msk.f32.vlgmr.msra.gmra.mrb[4].mxu1 %vm293_vm12, %v716_v36 }
 0x6c3   :  { %v804_v19 = vpop.f32.mrb[4].mxu1 }
 0x6c4   :  { %v806_v7 = vpop.f32.mrb[5].mxu1 }
 0x6c5   :  { %813 = vmatprep.subr.mxu0 %v806_v7 }
 0x6c6   :  { %814 = vmatpush1.msra.mxu0 %v804_v19 }
 0x6c7   :  { %1000 = vmatmul.mubr.msk.f32.vlgmr.msra.gmra.mrb[2].mxu0 %vm369_vm13, %v1354_v18 }
 0x6c8   :  { %956 = vmatprep.mubr.f32.mxu0 %v1150_v1  ;;  %v978_v1 = vld [vmem:[%s1472_s6] sm:$0xff] }
 0x79a   :  { %v879_v45 = vpop.f32.mrb[2].mxu0 }
 0x79b   :  { %v881_v49 = vpop.f32.mrb[3].mxu0 }
 0x79c   :  { %v884_v53 = vadd.f32 %v881_v49, %v879_v45 }
 0x79e   :  { %885 = vadd.xlane.f32.xlu0 %v884_v53 }
 0x82b   :  { %v886_v55 = vpop.xlane.xlu0 %885 }
 0x82c   :  { %v887_v57 = vmul.f32 0.001953125, %v886_v55 }
 0x82e   :  { %v888_v8 = vsub.f32 %v804_v19, %v887_v57  ;;  %v889_v9 = vsub.f32 %v806_v7, %v887_v57 }
 0x830   :  { %v890_v10 = vmul.f32 %v888_v8, %v888_v8  ;;  %v891_v11 = vmul.f32 %v889_v9, %v889_v9 }
 0x832   :  { %892 = vmatprep.subr.mxu0 %v891_v11 }
 0x833   :  { %893 = vmatpush1.msra.mxu0 %v890_v10 }
 0x834   :  { %1001 = vmatmul.mubr.msk.f32.vlgmr.msra.gmra.mrb[4].mxu0 %vm369_vm13, %v1354_v18 }
 0x907   :  { %v958_v43 = vpop.f32.mrb[4].mxu0 }
 0x908   :  { %v960_v14 = vpop.f32.mrb[5].mxu0 }
 0x909   :  { %v963_v15 = vadd.f32 %v960_v14, %v958_v43 }
 0x90b   :  { %964 = vadd.xlane.f32.xlu1 %v963_v15 }
 0x91c   :  { %981 = vperm.xlu1 %1110, %v978_v1  }
 0x998   :  { %v965_v16 = vpop.xlane.xlu1 %964 }
 0x999   :  { %v966_v59 = vmul.f32 0.001953125, %v965_v16 }
 0x99b   :  { %v968_v20 = vadd.f32 1e-05, %v966_v59 }
 0x99c   :  { %v982_v30 = vpop.permute.xlu1 %981 }
 0x99d   :  { %1148 = vrsqrt.f32 %v968_v20 }
 0x9a7   :  { %v1149_v25 = vpop.eup %1148 }
 0x9a8   :  { %v970_v26 = vmul.f32 %v1149_v25, %v967_v56 }
 0x9aa   :  { %973 = vperm.xlu0 %1109, %v970_v26  }
 0xa29   :  { %v974_v18 = vpop.permute.xlu0 %973 }
 0xa2a   :  { %v976_v27 = vmul.f32 %v974_v18, %v888_v8  ;;  %v977_v28 = vmul.f32 %v974_v18, %v889_v9 }
 0xa2c   :  { %v984_v32 = vadd.f32 %v982_v30, %v976_v27  ;;  %v985_v34 = vadd.f32 %v982_v30, %v977_v28 }
 0xa2e   :  { %v986_v35 = vadd.f32 %v984_v32, %v1218_v12  ;;  %v987_v37 = vadd.f32 %v985_v34, %v1223_v13 }
 0xa30   :  { %v988_v38 = vmax.f32 %v986_v35, 0.0  ;;  %v989_v21 = vmax.f32 %v987_v37, 0.0 }
 0xa32   :  { %990 = vst [vmem:[%s1474_s8] sm:$0xff] %v988_v38  ;;  %991 = vst [vmem:[%s1474_s8 + $0x8] sm:$0xff] %v989_v21 }

</bundles_post_ra>
